<compile_context>
chip_gen: v7x
topology: tpu7x:2x2x1
jax: 0.10.0
libtpu: 0.0.40
codegen_flags: <defaults>
</compile_context>

<pallas_src>
import functools

import jax
import jax.numpy as jnp
from jax.experimental import pallas as pl
from jax.experimental.pallas import tpu as pltpu

LANES = 128


def mlp_abs_kernel(p_ref, x_ref, o_ref):
    # p_ref: (2*H + 2,) f32 in SMEM, packed as
    #   p[0:H]     = r_j  (relu breakpoints; 0 for dead w1_j==0 units)
    #   p[H:2H]    = c_j  (0.5*w2_j*|w1_j|; 0 for dead units)
    #   p[2H]      = A    (sum_j 0.5*w1_j*w2_j)
    #   p[2H+1]    = B    (b2 + sum_j 0.5*b1_j*w2_j + dead-unit constants)
    # x_ref / o_ref: (block_rows, 128) f32 in VMEM (lane-dense).
    n_hidden = (p_ref.shape[0] - 2) // 2          # static -> fully unrolled
    xv = x_ref[...]
    acc = p_ref[2 * n_hidden] * xv + p_ref[2 * n_hidden + 1]   # A*x + B
    for j in range(n_hidden):
        acc = acc + p_ref[n_hidden + j] * jnp.abs(xv - p_ref[j])  # c_j*|x - r_j|
    o_ref[...] = acc.astype(o_ref.dtype)


def _pack_params(w1, b1, w2, b2):
    """Fold (w1,b1,w2,b2) into the |x - r| form: (r, c, A, B) as one flat f32 array."""
    w1f = jnp.ravel(w1).astype(jnp.float32)   # (H,)
    b1f = jnp.ravel(b1).astype(jnp.float32)   # (H,)
    w2f = jnp.ravel(w2).astype(jnp.float32)   # (H,)
    b2f = jnp.ravel(b2).astype(jnp.float32)   # (1,)

    live = w1f != 0.0
    safe_w1 = jnp.where(live, w1f, 1.0)
    r = jnp.where(live, -b1f / safe_w1, 0.0)
    c = jnp.where(live, 0.5 * w2f * jnp.abs(w1f), 0.0)
    A = jnp.sum(jnp.where(live, 0.5 * w1f * w2f, 0.0))
    # Dead (w1_j == 0) units contribute the constant w2_j * relu(b1_j).
    B = (b2f[0]
         + jnp.sum(jnp.where(live, 0.5 * b1f * w2f, 0.0))
         + jnp.sum(jnp.where(live, 0.0, w2f * jnp.maximum(b1f, 0.0))))
    return jnp.concatenate([r, c, A[None], B[None]])   # (2H + 2,)


@functools.partial(jax.jit, static_argnames=("max_block_rows",))
def net_forward(x, w1, b1, w2, b2, *, max_block_rows=2048):
    """x: (N, 1) f32.  PyTorch-style params: w1 (20,1), b1 (20,), w2 (1,20), b2 (1,)."""
    N = x.shape[0]
    rows = (N + LANES - 1) // LANES               # number of 128-lane rows

    if rows <= 16:
        # Tiny problem (N=1000 -> 8 rows): one grid step, full-array block.
        block_rows = rows
        rows_pad = rows
    else:
        # Large N: big blocks to amortize per-step overhead, but capped so the
        # grid has >= 2 "parallel" steps (v7x has 2 TensorCores per chip).
        block_rows = min(max_block_rows, max(8, (rows // 2) // 8 * 8))
        rows_pad = ((rows + block_rows - 1) // block_rows) * block_rows
    n_pad = rows_pad * LANES
    grid = (rows_pad // block_rows,)

    # Lane-dense view of x (pad only the ragged tail; all under this one jit).
    xf = jnp.ravel(x).astype(jnp.float32)
    if n_pad != N:
        xf = jnp.pad(xf, (0, n_pad - N))
    x2 = xf.reshape(rows_pad, LANES)

    params = _pack_params(w1, b1, w2, b2)         # single (42,) SMEM operand

    y2 = pl.pallas_call(
        mlp_abs_kernel,
        out_shape=jax.ShapeDtypeStruct((rows_pad, LANES), jnp.float32),
        grid=grid,
        in_specs=[
            pl.BlockSpec(memory_space=pltpu.MemorySpace.SMEM),     # packed params
            pl.BlockSpec((block_rows, LANES), lambda i: (i, 0)),   # x, lane-dense
        ],
        out_specs=pl.BlockSpec((block_rows, LANES), lambda i: (i, 0)),
        compiler_params=pltpu.CompilerParams(
            dimension_semantics=("parallel",)),
    )(params, x2)

    # Padded tail contains garbage by construction; slice it off before return.
    y = y2.reshape(-1)
    if n_pad != N:
        y = y[:N]
    return y.reshape(N, 1)


def net_reference(x, w1, b1, w2, b2):
    h = jnp.maximum(x @ w1.T + b1, 0.0)
    return h @ w2.T + b2


if __name__ == "__main__":
    key = jax.random.PRNGKey(0)
    k1, k2, k3, k4 = jax.random.split(key, 4)

    # Deterministic parameter init (PyTorch Linear-style uniform bounds).
    HID = 20
    bound1 = 1.0                      # fan_in = 1
    bound2 = 1.0 / (20.0 ** 0.5)      # fan_in = 20
    w1 = jax.random.uniform(k1, (HID, 1), jnp.float32, -bound1, bound1)
    b1 = jax.random.uniform(k2, (HID,), jnp.float32, -bound1, bound1)
    w2 = jax.random.uniform(k3, (1, HID), jnp.float32, -bound2, bound2)
    b2 = jax.random.uniform(k4, (1,), jnp.float32, -bound2, bound2)

    # Input: like the script's torch.unsqueeze(torch.linspace(-1, 1, 1000), dim=1)
    N = 1000
    x = jnp.linspace(-1.0, 1.0, N, dtype=jnp.float32).reshape(N, 1)

    y = net_forward(x, w1, b1, w2, b2)
    y = jax.block_until_ready(y)

    y_ref = net_reference(x, w1, b1, w2, b2)
    assert y.shape == (N, 1)
    assert jnp.allclose(y, y_ref, atol=1e-5, rtol=1e-5), "mismatch vs reference"

    print("KERNEL_OK")
</pallas_src>

<mosaic_0001>
module attributes {stable_mosaic.version = 11 : i64} {
  func.func @mlp_abs_kernel(%arg0: i32, %arg1: memref<42xf32, #tpu.memory_space<smem>>, %arg2: memref<8x128xf32, #tpu.memory_space<vmem>>, %arg3: memref<8x128xf32, #tpu.memory_space<vmem>>) attributes {dimension_semantics = [#tpu.dimension_semantics<parallel>], iteration_bounds = array<i64: 1>, scalar_prefetch = 0 : i64, scratch_operands = 0 : i64, tpu.core_type = #tpu.core_type<tc>, window_params = [{transform_indices = @transform_0, window_bounds = array<i64: 42>}, {transform_indices = @transform_1, window_bounds = array<i64: 8, 128>}, {transform_indices = @transform_2, window_bounds = array<i64: 8, 128>}]} {
    %c0 = arith.constant 0 : index
    %c0_0 = arith.constant 0 : index
    %0 = vector.load %arg2[%c0, %c0_0] : memref<8x128xf32, #tpu.memory_space<vmem>>, vector<8x128xf32>
    %c40 = arith.constant 40 : index
    %1 = memref.load %arg1[%c40] : memref<42xf32, #tpu.memory_space<smem>>
    %2 = vector.broadcast %1 : f32 to vector<8x128xf32>
    %3 = arith.mulf %2, %0 : vector<8x128xf32>
    %c41 = arith.constant 41 : index
    %4 = memref.load %arg1[%c41] : memref<42xf32, #tpu.memory_space<smem>>
    %5 = vector.broadcast %4 : f32 to vector<8x128xf32>
    %6 = arith.addf %3, %5 : vector<8x128xf32>
    %c20 = arith.constant 20 : index
    %7 = memref.load %arg1[%c20] : memref<42xf32, #tpu.memory_space<smem>>
    %c0_1 = arith.constant 0 : index
    %8 = memref.load %arg1[%c0_1] : memref<42xf32, #tpu.memory_space<smem>>
    %9 = vector.broadcast %8 : f32 to vector<8x128xf32>
    %10 = arith.subf %0, %9 : vector<8x128xf32>
    %11 = math.absf %10 : vector<8x128xf32>
    %12 = vector.broadcast %7 : f32 to vector<8x128xf32>
    %13 = arith.mulf %12, %11 : vector<8x128xf32>
    %14 = arith.addf %6, %13 : vector<8x128xf32>
    %c21 = arith.constant 21 : index
    %15 = memref.load %arg1[%c21] : memref<42xf32, #tpu.memory_space<smem>>
    %c1 = arith.constant 1 : index
    %16 = memref.load %arg1[%c1] : memref<42xf32, #tpu.memory_space<smem>>
    %17 = vector.broadcast %16 : f32 to vector<8x128xf32>
    %18 = arith.subf %0, %17 : vector<8x128xf32>
    %19 = math.absf %18 : vector<8x128xf32>
    %20 = vector.broadcast %15 : f32 to vector<8x128xf32>
    %21 = arith.mulf %20, %19 : vector<8x128xf32>
    %22 = arith.addf %14, %21 : vector<8x128xf32>
    %c22 = arith.constant 22 : index
    %23 = memref.load %arg1[%c22] : memref<42xf32, #tpu.memory_space<smem>>
    %c2 = arith.constant 2 : index
    %24 = memref.load %arg1[%c2] : memref<42xf32, #tpu.memory_space<smem>>
    %25 = vector.broadcast %24 : f32 to vector<8x128xf32>
    %26 = arith.subf %0, %25 : vector<8x128xf32>
    %27 = math.absf %26 : vector<8x128xf32>
    %28 = vector.broadcast %23 : f32 to vector<8x128xf32>
    %29 = arith.mulf %28, %27 : vector<8x128xf32>
    %30 = arith.addf %22, %29 : vector<8x128xf32>
    %c23 = arith.constant 23 : index
    %31 = memref.load %arg1[%c23] : memref<42xf32, #tpu.memory_space<smem>>
    %c3 = arith.constant 3 : index
    %32 = memref.load %arg1[%c3] : memref<42xf32, #tpu.memory_space<smem>>
    %33 = vector.broadcast %32 : f32 to vector<8x128xf32>
    %34 = arith.subf %0, %33 : vector<8x128xf32>
    %35 = math.absf %34 : vector<8x128xf32>
    %36 = vector.broadcast %31 : f32 to vector<8x128xf32>
    %37 = arith.mulf %36, %35 : vector<8x128xf32>
    %38 = arith.addf %30, %37 : vector<8x128xf32>
    %c24 = arith.constant 24 : index
    %39 = memref.load %arg1[%c24] : memref<42xf32, #tpu.memory_space<smem>>
    %c4 = arith.constant 4 : index
    %40 = memref.load %arg1[%c4] : memref<42xf32, #tpu.memory_space<smem>>
    %41 = vector.broadcast %40 : f32 to vector<8x128xf32>
    %42 = arith.subf %0, %41 : vector<8x128xf32>
    %43 = math.absf %42 : vector<8x128xf32>
    %44 = vector.broadcast %39 : f32 to vector<8x128xf32>
    %45 = arith.mulf %44, %43 : vector<8x128xf32>
    %46 = arith.addf %38, %45 : vector<8x128xf32>
    %c25 = arith.constant 25 : index
    %47 = memref.load %arg1[%c25] : memref<42xf32, #tpu.memory_space<smem>>
    %c5 = arith.constant 5 : index
    %48 = memref.load %arg1[%c5] : memref<42xf32, #tpu.memory_space<smem>>
    %49 = vector.broadcast %48 : f32 to vector<8x128xf32>
    %50 = arith.subf %0, %49 : vector<8x128xf32>
    %51 = math.absf %50 : vector<8x128xf32>
    %52 = vector.broadcast %47 : f32 to vector<8x128xf32>
    %53 = arith.mulf %52, %51 : vector<8x128xf32>
    %54 = arith.addf %46, %53 : vector<8x128xf32>
    %c26 = arith.constant 26 : index
    %55 = memref.load %arg1[%c26] : memref<42xf32, #tpu.memory_space<smem>>
    %c6 = arith.constant 6 : index
    %56 = memref.load %arg1[%c6] : memref<42xf32, #tpu.memory_space<smem>>
    %57 = vector.broadcast %56 : f32 to vector<8x128xf32>
    %58 = arith.subf %0, %57 : vector<8x128xf32>
    %59 = math.absf %58 : vector<8x128xf32>
    %60 = vector.broadcast %55 : f32 to vector<8x128xf32>
    %61 = arith.mulf %60, %59 : vector<8x128xf32>
    %62 = arith.addf %54, %61 : vector<8x128xf32>
    %c27 = arith.constant 27 : index
    %63 = memref.load %arg1[%c27] : memref<42xf32, #tpu.memory_space<smem>>
    %c7 = arith.constant 7 : index
    %64 = memref.load %arg1[%c7] : memref<42xf32, #tpu.memory_space<smem>>
    %65 = vector.broadcast %64 : f32 to vector<8x128xf32>
    %66 = arith.subf %0, %65 : vector<8x128xf32>
    %67 = math.absf %66 : vector<8x128xf32>
    %68 = vector.broadcast %63 : f32 to vector<8x128xf32>
    %69 = arith.mulf %68, %67 : vector<8x128xf32>
    %70 = arith.addf %62, %69 : vector<8x128xf32>
    %c28 = arith.constant 28 : index
    %71 = memref.load %arg1[%c28] : memref<42xf32, #tpu.memory_space<smem>>
    %c8 = arith.constant 8 : index
    %72 = memref.load %arg1[%c8] : memref<42xf32, #tpu.memory_space<smem>>
    %73 = vector.broadcast %72 : f32 to vector<8x128xf32>
    %74 = arith.subf %0, %73 : vector<8x128xf32>
    %75 = math.absf %74 : vector<8x128xf32>
    %76 = vector.broadcast %71 : f32 to vector<8x128xf32>
    %77 = arith.mulf %76, %75 : vector<8x128xf32>
    %78 = arith.addf %70, %77 : vector<8x128xf32>
    %c29 = arith.constant 29 : index
    %79 = memref.load %arg1[%c29] : memref<42xf32, #tpu.memory_space<smem>>
    %c9 = arith.constant 9 : index
    %80 = memref.load %arg1[%c9] : memref<42xf32, #tpu.memory_space<smem>>
    %81 = vector.broadcast %80 : f32 to vector<8x128xf32>
    %82 = arith.subf %0, %81 : vector<8x128xf32>
    %83 = math.absf %82 : vector<8x128xf32>
    %84 = vector.broadcast %79 : f32 to vector<8x128xf32>
    %85 = arith.mulf %84, %83 : vector<8x128xf32>
    %86 = arith.addf %78, %85 : vector<8x128xf32>
    %c30 = arith.constant 30 : index
    %87 = memref.load %arg1[%c30] : memref<42xf32, #tpu.memory_space<smem>>
    %c10 = arith.constant 10 : index
    %88 = memref.load %arg1[%c10] : memref<42xf32, #tpu.memory_space<smem>>
    %89 = vector.broadcast %88 : f32 to vector<8x128xf32>
    %90 = arith.subf %0, %89 : vector<8x128xf32>
    %91 = math.absf %90 : vector<8x128xf32>
    %92 = vector.broadcast %87 : f32 to vector<8x128xf32>
    %93 = arith.mulf %92, %91 : vector<8x128xf32>
    %94 = arith.addf %86, %93 : vector<8x128xf32>
    %c31 = arith.constant 31 : index
    %95 = memref.load %arg1[%c31] : memref<42xf32, #tpu.memory_space<smem>>
    %c11 = arith.constant 11 : index
    %96 = memref.load %arg1[%c11] : memref<42xf32, #tpu.memory_space<smem>>
    %97 = vector.broadcast %96 : f32 to vector<8x128xf32>
    %98 = arith.subf %0, %97 : vector<8x128xf32>
    %99 = math.absf %98 : vector<8x128xf32>
    %100 = vector.broadcast %95 : f32 to vector<8x128xf32>
    %101 = arith.mulf %100, %99 : vector<8x128xf32>
    %102 = arith.addf %94, %101 : vector<8x128xf32>
    %c32 = arith.constant 32 : index
    %103 = memref.load %arg1[%c32] : memref<42xf32, #tpu.memory_space<smem>>
    %c12 = arith.constant 12 : index
    %104 = memref.load %arg1[%c12] : memref<42xf32, #tpu.memory_space<smem>>
    %105 = vector.broadcast %104 : f32 to vector<8x128xf32>
    %106 = arith.subf %0, %105 : vector<8x128xf32>
    %107 = math.absf %106 : vector<8x128xf32>
    %108 = vector.broadcast %103 : f32 to vector<8x128xf32>
    %109 = arith.mulf %108, %107 : vector<8x128xf32>
    %110 = arith.addf %102, %109 : vector<8x128xf32>
    %c33 = arith.constant 33 : index
    %111 = memref.load %arg1[%c33] : memref<42xf32, #tpu.memory_space<smem>>
    %c13 = arith.constant 13 : index
    %112 = memref.load %arg1[%c13] : memref<42xf32, #tpu.memory_space<smem>>
    %113 = vector.broadcast %112 : f32 to vector<8x128xf32>
    %114 = arith.subf %0, %113 : vector<8x128xf32>
    %115 = math.absf %114 : vector<8x128xf32>
    %116 = vector.broadcast %111 : f32 to vector<8x128xf32>
    %117 = arith.mulf %116, %115 : vector<8x128xf32>
    %118 = arith.addf %110, %117 : vector<8x128xf32>
    %c34 = arith.constant 34 : index
    %119 = memref.load %arg1[%c34] : memref<42xf32, #tpu.memory_space<smem>>
    %c14 = arith.constant 14 : index
    %120 = memref.load %arg1[%c14] : memref<42xf32, #tpu.memory_space<smem>>
    %121 = vector.broadcast %120 : f32 to vector<8x128xf32>
    %122 = arith.subf %0, %121 : vector<8x128xf32>
    %123 = math.absf %122 : vector<8x128xf32>
    %124 = vector.broadcast %119 : f32 to vector<8x128xf32>
    %125 = arith.mulf %124, %123 : vector<8x128xf32>
    %126 = arith.addf %118, %125 : vector<8x128xf32>
    %c35 = arith.constant 35 : index
    %127 = memref.load %arg1[%c35] : memref<42xf32, #tpu.memory_space<smem>>
    %c15 = arith.constant 15 : index
    %128 = memref.load %arg1[%c15] : memref<42xf32, #tpu.memory_space<smem>>
    %129 = vector.broadcast %128 : f32 to vector<8x128xf32>
    %130 = arith.subf %0, %129 : vector<8x128xf32>
    %131 = math.absf %130 : vector<8x128xf32>
    %132 = vector.broadcast %127 : f32 to vector<8x128xf32>
    %133 = arith.mulf %132, %131 : vector<8x128xf32>
    %134 = arith.addf %126, %133 : vector<8x128xf32>
    %c36 = arith.constant 36 : index
    %135 = memref.load %arg1[%c36] : memref<42xf32, #tpu.memory_space<smem>>
    %c16 = arith.constant 16 : index
    %136 = memref.load %arg1[%c16] : memref<42xf32, #tpu.memory_space<smem>>
    %137 = vector.broadcast %136 : f32 to vector<8x128xf32>
    %138 = arith.subf %0, %137 : vector<8x128xf32>
    %139 = math.absf %138 : vector<8x128xf32>
    %140 = vector.broadcast %135 : f32 to vector<8x128xf32>
    %141 = arith.mulf %140, %139 : vector<8x128xf32>
    %142 = arith.addf %134, %141 : vector<8x128xf32>
    %c37 = arith.constant 37 : index
    %143 = memref.load %arg1[%c37] : memref<42xf32, #tpu.memory_space<smem>>
    %c17 = arith.constant 17 : index
    %144 = memref.load %arg1[%c17] : memref<42xf32, #tpu.memory_space<smem>>
    %145 = vector.broadcast %144 : f32 to vector<8x128xf32>
    %146 = arith.subf %0, %145 : vector<8x128xf32>
    %147 = math.absf %146 : vector<8x128xf32>
    %148 = vector.broadcast %143 : f32 to vector<8x128xf32>
    %149 = arith.mulf %148, %147 : vector<8x128xf32>
    %150 = arith.addf %142, %149 : vector<8x128xf32>
    %c38 = arith.constant 38 : index
    %151 = memref.load %arg1[%c38] : memref<42xf32, #tpu.memory_space<smem>>
    %c18 = arith.constant 18 : index
    %152 = memref.load %arg1[%c18] : memref<42xf32, #tpu.memory_space<smem>>
    %153 = vector.broadcast %152 : f32 to vector<8x128xf32>
    %154 = arith.subf %0, %153 : vector<8x128xf32>
    %155 = math.absf %154 : vector<8x128xf32>
    %156 = vector.broadcast %151 : f32 to vector<8x128xf32>
    %157 = arith.mulf %156, %155 : vector<8x128xf32>
    %158 = arith.addf %150, %157 : vector<8x128xf32>
    %c39 = arith.constant 39 : index
    %159 = memref.load %arg1[%c39] : memref<42xf32, #tpu.memory_space<smem>>
    %c19 = arith.constant 19 : index
    %160 = memref.load %arg1[%c19] : memref<42xf32, #tpu.memory_space<smem>>
    %161 = vector.broadcast %160 : f32 to vector<8x128xf32>
    %162 = arith.subf %0, %161 : vector<8x128xf32>
    %163 = math.absf %162 : vector<8x128xf32>
    %164 = vector.broadcast %159 : f32 to vector<8x128xf32>
    %165 = arith.mulf %164, %163 : vector<8x128xf32>
    %166 = arith.addf %158, %165 : vector<8x128xf32>
    %c0_2 = arith.constant 0 : index
    %c0_3 = arith.constant 0 : index
    %167 = vector.load %arg3[%c0_2, %c0_3] : memref<8x128xf32, #tpu.memory_space<vmem>>, vector<8x128xf32>
    tpu.vector_store %arg3[%c0_2, %c0_3], %166 {strides = array<i32>} : memref<8x128xf32, #tpu.memory_space<vmem>>, vector<8x128xf32>,
    return
  }
  func.func @transform_0(%arg0: i32) -> i32 {
    %c0_i32 = arith.constant 0 : i32
    %c0_i32_0 = arith.constant 0 : i32
    return %c0_i32 : i32
  }
  func.func @transform_1(%arg0: i32) -> (i32, i32) {
    %c0_i32 = arith.constant 0 : i32
    %c0_i32_0 = arith.constant 0 : i32
    return %arg0, %c0_i32 : i32, i32
  }
  func.func @transform_2(%arg0: i32) -> (i32, i32) {
    %c0_i32 = arith.constant 0 : i32
    %c0_i32_0 = arith.constant 0 : i32
    return %arg0, %c0_i32 : i32, i32
  }
}

</mosaic_0001>

<bundles_post_ra>
// kernel: net_forward.1
= control target key start
LH: loop header
LB: loop body
LE: loop exit
PB: predicated region body
PF: predicated region fallthrough
CT: control target
= control target key end

     0   :  { %7 = vsyncpa [#allocation4], 0  ;;  %s446_s0 = inlined_call_operand.vmem [shape: f32[42], index: 0, kind: input, shape index: {}]   ;;  %s447_s1 = inlined_call_operand.vmem [shape: f32[8,128], index: 1, kind: input, shape index: {}]   ;;  %s448_s2 = inlined_call_operand.hbm [shape: f32[8,128], index: 2, kind: output, shape index: {}]  }
   0x1   :  { %8 = vsyncpa [#allocation3], 0  ;;  %s15_s11 = sshll.u32 %s446_s0, 4  ;;  %s16_s11 = int_to_ptr.vmem [resolvable:$true] %s15_s11 }
   0x2   :  { %s251_s12 = scalar_lea.vmem %s16_s11, 16  ;;  %p256_p1 = scmp.lt.s32.totalorder %s16_s11, %s16_s11 }
   0x3   :  { %p252_p0 = scmp.ne.s32.totalorder %s16_s11, %s251_s12  ;;  %p257_p2 = scmp.lt.s32.totalorder %s251_s12, %s251_s12 }
   0x5   :  { %p258_p3 = por %p257_p2, %p256_p1 }
   0x7   :  { %p259_p4 = pnand %p258_p3, %p252_p0 }
   0x9   :  { %262 = shalt.err (!%p259_p4)
}
   0xa   :  { %s289_s13 = smov [#allocation2]  }
   0xb   :  { %18 = dma.vmem_to_smem %s16_s11, 16, %s289_s13, [#allocation4]  }
   0xc   :  { %285 = dma.done.wait [#allocation4], 16  }
   0xd   :  { %286 = vsyncadd [#allocation4], 4294967280 }
   0xe   :  { %24 = sfence }
   0xf   :  { %s208_s14 = sld [smem:[#allocation2 + $0x28]]  ;;  %s209_s15 = sld [smem:[#allocation2 + $0x29]]  ;;  %v320_v0 = vld [vmem:[%s447_s1] sm:$0xff] }
  0x10   :  { %s309_s16 = sld [smem:[#allocation2 + $0x14]]  ;;  %s33_s17 = sld [smem:[#allocation2]] }
  0x11   :  { %s311_s18 = sld [smem:[#allocation2 + $0x15]]  ;;  %s212_s0 = sld [smem:[#allocation2 + $0x1]] }
  0x12   :  { %s313_s19 = sld [smem:[#allocation2 + $0x16]]  ;;  %s214_s20 = sld [smem:[#allocation2 + $0x2]] }
  0x13   :  { %s315_s21 = sld [smem:[#allocation2 + $0x17]]  ;;  %s216_s22 = sld [smem:[#allocation2 + $0x3]] }
  0x14   :  { %s322_s25 = sld [smem:[#allocation2 + $0x18]]  ;;  %s218_s26 = sld [smem:[#allocation2 + $0x4]] }
  0x15   :  { %v27_v1 = vstv %s208_s14  ;;  %v30_v2 = vstv %s209_s15  ;;  %s324_s27 = sld [smem:[#allocation2 + $0x5]]  ;;  %s327_s28 = sld [smem:[#allocation2 + $0x6]] }
  0x16   :  { %v28_v3 = vmul.f32 %v27_v1, %v320_v0  ;;  %v34_v4 = vstv %s33_s17  ;;  %v37_v6 = vstv %s309_s16  ;;  %s331_s1 = sld [smem:[#allocation2 + $0x19]]  ;;  %s333_s29 = sld [smem:[#allocation2 + $0x7]] }
  0x17   :  { %v35_v5 = vsub.f32 %v320_v0, %v34_v4  ;;  %v42_v7 = vstv %s212_s0  ;;  %v45_v10 = vstv %s311_s18  ;;  %s337_s30 = sld [smem:[#allocation2 + $0x8]]  ;;  %s341_s3 = sld [smem:[#allocation2 + $0x9]] }
  0x18   :  { %v31_v8 = vadd.f32 %v30_v2, %v28_v3  ;;  %v43_v9 = vsub.f32 %v320_v0, %v42_v7  ;;  %v50_v11 = vstv %s214_s20  ;;  %v53_v14 = vstv %s313_s19  ;;  %s345_s4 = sld [smem:[#allocation2 + $0x1a]]  ;;  %s353_s6 = sld [smem:[#allocation2 + $0x1b]] }
  0x19   :  { %v36_v12 = vand.u32 2147483647, %v35_v5  ;;  %v51_v13 = vsub.f32 %v320_v0, %v50_v11  ;;  %v58_v15 = vstv %s216_s22  ;;  %v61_v18 = vstv %s315_s21  ;;  %s349_s5 = sld [smem:[#allocation2 + $0xa]]  ;;  %s355_s7 = sld [smem:[#allocation2 + $0xb]] }
  0x1a   :  { %v44_v16 = vand.u32 2147483647, %v43_v9  ;;  %v59_v17 = vsub.f32 %v320_v0, %v58_v15  ;;  %v66_v19 = vstv %s218_s26  ;;  %v69_v26 = vstv %s322_s25  ;;  %s359_s8 = sld [smem:[#allocation2 + $0x1c]]  ;;  %s367_s10 = sld [smem:[#allocation2 + $0x1d]] }
  0x1b   :  { %v38_v20 = vmul.f32 %v37_v6, %v36_v12  ;;  %v52_v21 = vand.u32 2147483647, %v51_v13  ;;  %v67_v22 = vsub.f32 %v320_v0, %v66_v19  ;;  %v74_v23 = vstv %s324_s27  ;;  %s361_s9 = sld [smem:[#allocation2 + $0xc]]  ;;  %s369_s11 = sld [smem:[#allocation2 + $0xd]] }
  0x1c   :  { %v46_v24 = vmul.f32 %v45_v10, %v44_v16  ;;  %v60_v25 = vand.u32 2147483647, %v59_v17  ;;  %v75_v27 = vsub.f32 %v320_v0, %v74_v23  ;;  %v82_v31 = vstv %s327_s28  ;;  %s374_s12 = sld [smem:[#allocation2 + $0x1e]]  ;;  %s381_s14 = sld [smem:[#allocation2 + $0x1f]] }
  0x1d   :  { %v39_v28 = vadd.f32 %v38_v20, %v31_v8  ;;  %v54_v29 = vmul.f32 %v53_v14, %v52_v21  ;;  %v68_v30 = vand.u32 2147483647, %v67_v22  ;;  %v83_v33 = vsub.f32 %v320_v0, %v82_v31  ;;  %s376_s13 = sld [smem:[#allocation2 + $0xe]]  ;;  %s384_s15 = sld [smem:[#allocation2 + $0xf]] }
  0x1e   :  { %v76_v32 = vand.u32 2147483647, %v75_v27  ;;  %v62_v35 = vmul.f32 %v61_v18, %v60_v25  ;;  %v77_v36 = vstv %s331_s1  ;;  %v90_v37 = vstv %s333_s29  ;;  %s388_s16 = sld [smem:[#allocation2 + $0x20]]  ;;  %s395_s18 = sld [smem:[#allocation2 + $0x21]] }
  0x1f   :  { %v47_v34 = vadd.f32 %v46_v24, %v39_v28  ;;  %v70_v38 = vmul.f32 %v69_v26, %v68_v30  ;;  %v91_v39 = vsub.f32 %v320_v0, %v90_v37  ;;  %v98_v40 = vstv %s337_s30  ;;  %s391_s17 = sld [smem:[#allocation2 + $0x10]]  ;;  %s398_s0 = sld [smem:[#allocation2 + $0x11]] }
  0x20   :  { %v84_v42 = vand.u32 2147483647, %v83_v33  ;;  %v99_v43 = vsub.f32 %v320_v0, %v98_v40  ;;  %v106_v44 = vstv %s341_s3  ;;  %v78_v45 = vmul.f32 %v77_v36, %v76_v32  ;;  %s402_s19 = sld [smem:[#allocation2 + $0x22]]  ;;  %s409_s21 = sld [smem:[#allocation2 + $0x23]] }
  0x21   :  { %v55_v41 = vadd.f32 %v54_v29, %v47_v34  ;;  %v85_v46 = vstv %s345_s4  ;;  %v92_v48 = vand.u32 2147483647, %v91_v39  ;;  %v107_v49 = vsub.f32 %v320_v0, %v106_v44  ;;  %s405_s20 = sld [smem:[#allocation2 + $0x12]]  ;;  %s412_s22 = sld [smem:[#allocation2 + $0x13]] }
  0x22   :  { %v114_v50 = vstv %s349_s5  ;;  %v93_v51 = vstv %s353_s6  ;;  %v122_v52 = vstv %s355_s7  ;;  %v86_v54 = vmul.f32 %v85_v46, %v84_v42  ;;  %s416_s23 = sld [smem:[#allocation2 + $0x24]]  ;;  %s421_s24 = sld [smem:[#allocation2 + $0x25]] }
  0x23   :  { %v63_v47 = vadd.f32 %v62_v35, %v55_v41  ;;  %v100_v55 = vand.u32 2147483647, %v99_v43  ;;  %v115_v56 = vsub.f32 %v320_v0, %v114_v50  ;;  %v101_v57 = vstv %s359_s8  ;;  %s245_s25 = sld [smem:[#allocation2 + $0x26]]  ;;  %s247_s26 = sld [smem:[#allocation2 + $0x27]] }
  0x24   :  { %v130_v58 = vstv %s361_s9  ;;  %v94_v60 = vmul.f32 %v93_v51, %v92_v48  ;;  %v108_v61 = vand.u32 2147483647, %v107_v49  ;;  %v123_v62 = vsub.f32 %v320_v0, %v122_v52  ;;  %s290_s27 = smov [#allocation5]  }
  0x25   :  { %v71_v53 = vadd.f32 %v70_v38, %v63_v47  ;;  %v109_v63 = vstv %s367_s10  ;;  %v138_v1 = vstv %s369_s11  ;;  %v102_v3 = vmul.f32 %v101_v57, %v100_v55  ;;  %s199_s28 = sshll.u32 %s290_s27, 4  ;;  %s200_s28 = int_to_ptr.vmem [resolvable:$true] %s199_s28 }
  0x26   :  { %v116_v4 = vand.u32 2147483647, %v115_v56  ;;  %v131_v5 = vsub.f32 %v320_v0, %v130_v58  ;;  %v117_v6 = vstv %s374_s12  ;;  %v146_v7 = vstv %s376_s13  ;;  %s263_s1 = scalar_lea.vmem %s200_s28, 128  ;;  %p268_p6 = scmp.lt.s32.totalorder %s200_s28, %s200_s28 }
  0x27   :  { %v79_v59 = vadd.f32 %v78_v45, %v71_v53  ;;  %v110_v9 = vmul.f32 %v109_v63, %v108_v61  ;;  %v124_v10 = vand.u32 2147483647, %v123_v62  ;;  %v139_v11 = vsub.f32 %v320_v0, %v138_v1  ;;  %p264_p5 = scmp.ne.s32.totalorder %s200_s28, %s263_s1  ;;  %p269_p7 = scmp.lt.s32.totalorder %s263_s1, %s263_s1 }
  0x28   :  { %v125_v12 = vstv %s381_s14  ;;  %v154_v13 = vstv %s384_s15  ;;  %v118_v15 = vmul.f32 %v117_v6, %v116_v4  ;;  %v132_v16 = vand.u32 2147483647, %v131_v5 }
  0x29   :  { %v87_v2 = vadd.f32 %v86_v54, %v79_v59  ;;  %v147_v17 = vsub.f32 %v320_v0, %v146_v7  ;;  %v133_v18 = vstv %s388_s16  ;;  %v162_v19 = vstv %s391_s17  ;;  %p270_p8 = por %p269_p7, %p268_p6 }
  0x2a   :  { %v126_v21 = vmul.f32 %v125_v12, %v124_v10  ;;  %v140_v22 = vand.u32 2147483647, %v139_v11  ;;  %v155_v23 = vsub.f32 %v320_v0, %v154_v13  ;;  %v141_v24 = vstv %s395_s18 }
  0x2b   :  { %v95_v8 = vadd.f32 %v94_v60, %v87_v2  ;;  %v170_v25 = vstv %s398_s0  ;;  %v134_v27 = vmul.f32 %v133_v18, %v132_v16  ;;  %v148_v28 = vand.u32 2147483647, %v147_v17  ;;  %p271_p9 = pnand %p270_p8, %p264_p5 }
  0x2c   :  { %v163_v29 = vsub.f32 %v320_v0, %v162_v19  ;;  %v149_v30 = vstv %s402_s19  ;;  %v178_v31 = vstv %s405_s20  ;;  %v142_v33 = vmul.f32 %v141_v24, %v140_v22 }
  0x2d   :  { %v103_v14 = vadd.f32 %v102_v3, %v95_v8  ;;  %v156_v34 = vand.u32 2147483647, %v155_v23  ;;  %v171_v35 = vsub.f32 %v320_v0, %v170_v25  ;;  %v157_v36 = vstv %s409_s21 }
  0x2e   :  { %v186_v37 = vstv %s412_s22  ;;  %v150_v39 = vmul.f32 %v149_v30, %v148_v28  ;;  %v164_v40 = vand.u32 2147483647, %v163_v29  ;;  %v179_v41 = vsub.f32 %v320_v0, %v178_v31 }
  0x2f   :  { %v111_v20 = vadd.f32 %v110_v9, %v103_v14  ;;  %v165_v42 = vstv %s416_s23  ;;  %v158_v44 = vmul.f32 %v157_v36, %v156_v34  ;;  %v172_v45 = vand.u32 2147483647, %v171_v35 }
  0x30   :  { %v187_v46 = vsub.f32 %v320_v0, %v186_v37  ;;  %v173_v47 = vstv %s421_s24  ;;  %v166_v49 = vmul.f32 %v165_v42, %v164_v40  ;;  %v180_v50 = vand.u32 2147483647, %v179_v41 }
  0x31   :  { %v119_v26 = vadd.f32 %v118_v15, %v111_v20  ;;  %v181_v51 = vstv %s245_s25  ;;  %v174_v53 = vmul.f32 %v173_v47, %v172_v45  ;;  %v189_v55 = vstv %s247_s26 }
  0x32   :  { %v188_v54 = vand.u32 2147483647, %v187_v46  ;;  %v182_v57 = vmul.f32 %v181_v51, %v180_v50 }
  0x33   :  { %v127_v32 = vadd.f32 %v126_v21, %v119_v26 }
  0x34   :  { %v190_v59 = vmul.f32 %v189_v55, %v188_v54 }
  0x35   :  { %v135_v38 = vadd.f32 %v134_v27, %v127_v32 }
  0x37   :  { %v143_v43 = vadd.f32 %v142_v33, %v135_v38 }
  0x39   :  { %v151_v48 = vadd.f32 %v150_v39, %v143_v43 }
  0x3b   :  { %v159_v52 = vadd.f32 %v158_v44, %v151_v48 }
  0x3d   :  { %v167_v56 = vadd.f32 %v166_v49, %v159_v52 }
  0x3f   :  { %v175_v58 = vadd.f32 %v174_v53, %v167_v56 }
  0x41   :  { %v183_v60 = vadd.f32 %v182_v57, %v175_v58 }
  0x43   :  { %v191_v61 = vadd.f32 %v190_v59, %v183_v60 }
  0x45   :  { %192 = vst [vmem:[#allocation5] sm:$0xff] %v191_v61 }
  0x46   :  { %274 = shalt.err (!%p271_p9)
}
  0x47   :  { %s275_s3 = scalar_lea.hbm %s448_s2, 128 }
  0x48   :  { %p276_p10 = scmp.ne.s32.totalorder %s448_s2, %s275_s3  ;;  %p279_p11 = scmp.lt.u32.totalorder %s275_s3, %s448_s2 }
  0x4a   :  { %p281_p12 = pnand %p279_p11, %p276_p10 }
  0x4c   :  { %284 = shalt.err (!%p281_p12)
}
  0x4d   :  { %202 = dma.vmem_to_hbm [thread:$0]  %s200_s28, 128, %s448_s2, [#allocation3]  }
  0x4e   :  { %287 = dma.done.wait [#allocation3], 128  }
  0x4f   :  { %288 = vsyncadd [#allocation3], 4294967168 }
  0x50   :  { %206 = vsyncpa [#allocation3], 1 }
  0x51   :  { %207 = vsyncpa [#allocation4], 1 }

</bundles_post_ra>
